<compile_context>
chip_gen: v5e
topology: v5e:2x2
jax: 0.10.0
libtpu: 0.0.40
codegen_flags: <defaults>
</compile_context>

<pallas_src>
import jax
import jax.numpy as jnp
from jax.experimental import pallas as pl
from jax.experimental.pallas import tpu as pltpu

LANE = 128
MAX_TILE_ROWS = 512          # sublane rows per grid step (65536 px / step)


def _lovasz_kernel(tri_ref, rank_ref, nege_ref, gt_ref, diffc_ref, out_ref):
    # tri_ref  : (128, 128) bf16 — inclusive lane triangle (i <= j), hoisted
    # rank_ref : (S, 128)   f32  — within-tile 1-based rank r*128 + l + 1
    # nege_ref : (1, S, 128) f32 — sorted -(hinge error), ascending
    # gt_ref   : (1, S, 128) bf16 — labels permuted by the same sort (0/1)
    # diffc_ref: (1, S, 1)  f32  — G - (positives in earlier sorted rows)
    # out_ref  : (1, 1, 8, 128) f32 — per-(image, tile) partial-sum slab
    t = pl.program_id(1)
    S = nege_ref.shape[1]

    neg_e = nege_ref[0]                                   # (S, 128) f32
    gt_b = gt_ref[0]                                      # (S, 128) bf16
    diffc = diffc_ref[0]                                  # (S, 1)   f32

    # within-row (lane-axis) inclusive cumsum of labels — one small MXU matmul
    lane_cum = jnp.dot(gt_b, tri_ref[...], preferred_element_type=jnp.float32)

    # global 1-based rank in the image's descending-error order
    k = rank_ref[...] + (t * (S * LANE)).astype(jnp.float32)

    # Union at rank k:  U_k = G + k - c_k  =  k + (G - row_prefix) - lane_cum
    u_k = k + diffc - lane_cum
    u_p = u_k - 1.0 + gt_b.astype(jnp.float32)            # U_{k-1}

    # Lovasz gradient: grad_k = J_k - J_{k-1},  J_m = m / U_m,  J_0 = 0.
    # U_k >= max(G, k) >= 1; U_{k-1} >= 1 for k >= 2; for k == 1 the
    # numerator (k-1) is 0 so the clamp value never matters.
    grad = (k * pl.reciprocal(u_k)
            - (k - 1.0) * pl.reciprocal(jnp.maximum(u_p, 1.0)))

    # relu(error) * grad; padded entries have neg_e = +1e30 -> relu == 0
    contrib = jnp.maximum(-neg_e, 0.0) * grad              # (S, 128)

    # fold to a lane-dense (8, 128) slab (pure VALU adds) and write it
    out_ref[...] = jnp.sum(contrib.reshape(S // 8, 8, LANE), axis=0)[None, None]


def lovasz_hinge_loss(logits, targets):
    """Lovasz hinge loss, per_image=True.  logits/targets: (N,1,H,W) or (N,H,W)."""
    if logits.ndim == 4:
        logits = jnp.squeeze(logits, axis=1)
    if targets.ndim == 4:
        targets = jnp.squeeze(targets, axis=1)
    N = logits.shape[0]
    P = 1
    for d in logits.shape[1:]:
        P *= d

    logits = logits.reshape(N, P).astype(jnp.float32)
    labels = targets.reshape(N, P).astype(jnp.float32)

    signs = 2.0 * labels - 1.0
    neg_errors = logits * signs - 1.0          # == -(1 - logit*sign)

    # tile sizing: multiple of 128 rows, as big as useful, capped for VMEM
    rows = -(-P // LANE)
    S = min(MAX_TILE_ROWS, -(-rows // LANE) * LANE)
    n_tiles = -(-rows // S)
    R = n_tiles * S
    pad = R * LANE - P

    # pad: huge key -> sorts to the end, label 0 -> contributes exactly 0
    neg_errors = jnp.pad(neg_errors, ((0, 0), (0, pad)), constant_values=1e30)
    labels_bf = jnp.pad(labels.astype(jnp.bfloat16), ((0, 0), (0, pad)))

    # ascending sort by -error == descending sort by error, bf16 labels carried
    neg_sorted, gt_sorted = jax.lax.sort(
        (neg_errors, labels_bf), dimension=-1, is_stable=False, num_keys=1)
    neg_sorted = neg_sorted.reshape(N, R, LANE)
    gt_sorted = gt_sorted.reshape(N, R, LANE)

    # per-row (128-px chunk) positive counts in sorted order, f32-accumulated;
    # exact for images up to 2^24 pixels.
    row_sums = jnp.sum(gt_sorted.astype(jnp.float32), axis=-1)      # (N, R)
    g_total = jnp.sum(row_sums, axis=-1, keepdims=True)             # (N, 1)
    row_excl = jnp.cumsum(row_sums, axis=-1) - row_sums             # exclusive
    diff_carry = (g_total - row_excl).reshape(N, R, 1)              # (N, R, 1)

    # hoisted kernel constants (DMA'd once via constant index_map)
    tri_lane = (jax.lax.broadcasted_iota(jnp.int32, (LANE, LANE), 0)
                <= jax.lax.broadcasted_iota(jnp.int32, (LANE, LANE), 1)
                ).astype(jnp.bfloat16)
    base_rank = (jax.lax.broadcasted_iota(jnp.float32, (S, LANE), 0) * LANE
                 + jax.lax.broadcasted_iota(jnp.float32, (S, LANE), 1) + 1.0)

    out = pl.pallas_call(
        _lovasz_kernel,
        out_shape=jax.ShapeDtypeStruct((N, n_tiles, 8, LANE), jnp.float32),
        grid_spec=pltpu.PrefetchScalarGridSpec(
            num_scalar_prefetch=0,
            grid=(N, n_tiles),
            in_specs=[
                pl.BlockSpec((LANE, LANE), lambda n, t: (0, 0)),
                pl.BlockSpec((S, LANE), lambda n, t: (0, 0)),
                pl.BlockSpec((1, S, LANE), lambda n, t: (n, t, 0)),
                pl.BlockSpec((1, S, LANE), lambda n, t: (n, t, 0)),
                pl.BlockSpec((1, S, 1), lambda n, t: (n, t, 0)),
            ],
            out_specs=pl.BlockSpec((1, 1, 8, LANE), lambda n, t: (n, t, 0, 0)),
        ),
        compiler_params=pltpu.CompilerParams(
            dimension_semantics=("parallel", "parallel")),
    )(tri_lane, base_rank, neg_sorted, gt_sorted, diff_carry)

    per_image = jnp.sum(out, axis=(1, 2, 3))               # (N,)
    return jnp.mean(per_image)


def _reference_lovasz_hinge(logits_nhw, labels_nhw):
    """Pure-JAX reference mirroring lovasz_hinge(per_image=True)."""
    N = logits_nhw.shape[0]
    lg = logits_nhw.reshape(N, -1).astype(jnp.float32)
    lb = labels_nhw.reshape(N, -1).astype(jnp.float32)

    def per_image(lgi, lbi):
        signs = 2.0 * lbi - 1.0
        errors = 1.0 - lgi * signs
        order = jnp.argsort(-errors)
        e_s = errors[order]
        gt_s = lbi[order]
        gts = jnp.sum(gt_s)
        inter = gts - jnp.cumsum(gt_s)
        union = gts + jnp.cumsum(1.0 - gt_s)
        jac = 1.0 - inter / union
        jac = jnp.concatenate([jac[:1], jac[1:] - jac[:-1]])
        return jnp.sum(jnp.maximum(e_s, 0.0) * jac)

    return jnp.mean(jax.vmap(per_image)(lg, lb))


if __name__ == "__main__":
    key = jax.random.PRNGKey(0)
    k1, k2 = jax.random.split(key)
    N, H, W = 2, 16, 16
    logits = jax.random.normal(k1, (N, 1, H, W), dtype=jnp.float32)
    target = jax.random.randint(k2, (N, 1, H, W), 0, 2).astype(jnp.float32)

    loss = jax.block_until_ready(jax.jit(lovasz_hinge_loss)(logits, target))
    ref = jax.block_until_ready(
        _reference_lovasz_hinge(jnp.squeeze(logits, 1), jnp.squeeze(target, 1)))
    assert jnp.allclose(loss, ref, rtol=1e-3, atol=1e-3), (loss, ref)
    print("KERNEL_OK")
</pallas_src>

<mosaic_0001>
module attributes {stable_mosaic.version = 11 : i64} {
  func.func @_lovasz_kernel(%arg0: i32, %arg1: i32, %arg2: memref<128x128xbf16, #tpu.memory_space<vmem>>, %arg3: memref<128x128xf32, #tpu.memory_space<vmem>>, %arg4: memref<1x128x128xf32, #tpu.memory_space<vmem>>, %arg5: memref<1x128x128xbf16, #tpu.memory_space<vmem>>, %arg6: memref<1x128x1xf32, #tpu.memory_space<vmem>>, %arg7: memref<1x1x8x128xf32, #tpu.memory_space<vmem>>) attributes {dimension_semantics = [#tpu.dimension_semantics<parallel>, #tpu.dimension_semantics<parallel>], iteration_bounds = array<i64: 2, 1>, scalar_prefetch = 0 : i64, scratch_operands = 0 : i64, tpu.core_type = #tpu.core_type<tc>, window_params = [{pipeline_mode = #tpu.pipeline_mode<synchronous>, transform_indices = @transform_0, window_bounds = array<i64: 128, 128>}, {pipeline_mode = #tpu.pipeline_mode<synchronous>, transform_indices = @transform_1, window_bounds = array<i64: 128, 128>}, {transform_indices = @transform_2, window_bounds = array<i64: 1, 128, 128>}, {transform_indices = @transform_3, window_bounds = array<i64: 1, 128, 128>}, {transform_indices = @transform_4, window_bounds = array<i64: 1, 128, 1>}, {transform_indices = @transform_5, window_bounds = array<i64: 1, 1, 8, 128>}]} {
    %c0 = arith.constant 0 : index
    %c0_0 = arith.constant 0 : index
    %c0_1 = arith.constant 0 : index
    %0 = vector.load %arg4[%c0, %c0_0, %c0_1] : memref<1x128x128xf32, #tpu.memory_space<vmem>>, vector<1x128x128xf32>
    %1 = vector.shape_cast %0 : vector<1x128x128xf32> to vector<128x128xf32>
    %c0_2 = arith.constant 0 : index
    %c0_3 = arith.constant 0 : index
    %c0_4 = arith.constant 0 : index
    %2 = vector.load %arg5[%c0_2, %c0_3, %c0_4] : memref<1x128x128xbf16, #tpu.memory_space<vmem>>, vector<1x128x128xbf16>
    %3 = vector.shape_cast %2 : vector<1x128x128xbf16> to vector<128x128xbf16>
    %c0_5 = arith.constant 0 : index
    %c0_6 = arith.constant 0 : index
    %c0_7 = arith.constant 0 : index
    %4 = vector.load %arg6[%c0_5, %c0_6, %c0_7] : memref<1x128x1xf32, #tpu.memory_space<vmem>>, vector<1x128x1xf32>
    %5 = vector.shape_cast %4 : vector<1x128x1xf32> to vector<128x1xf32>
    %c0_8 = arith.constant 0 : index
    %c0_9 = arith.constant 0 : index
    %6 = vector.load %arg2[%c0_8, %c0_9] : memref<128x128xbf16, #tpu.memory_space<vmem>>, vector<128x128xbf16>
    %cst = arith.constant dense<0.000000e+00> : vector<128x128xf32>
    %7 = tpu.matmul %3, %6, %cst {dimension_numbers = #tpu.dot_dimension_numbers<[1], [0], [0], [1], [0, 0, 1, 1], [], []>} : vector<128x128xbf16>, vector<128x128xbf16>, vector<128x128xf32> -> vector<128x128xf32>
    %c0_10 = arith.constant 0 : index
    %c0_11 = arith.constant 0 : index
    %8 = vector.load %arg3[%c0_10, %c0_11] : memref<128x128xf32, #tpu.memory_space<vmem>>, vector<128x128xf32>
    %c16384_i32 = arith.constant 16384 : i32
    %9 = arith.muli %arg1, %c16384_i32 : i32
    %10 = arith.sitofp %9 : i32 to f32
    %11 = vector.broadcast %10 : f32 to vector<128x128xf32>
    %12 = arith.addf %8, %11 : vector<128x128xf32>
    %13 = vector.broadcast %5 : vector<128x1xf32> to vector<128x128xf32>
    %14 = arith.addf %12, %13 : vector<128x128xf32>
    %15 = arith.subf %14, %7 : vector<128x128xf32>
    %cst_12 = arith.constant 1.000000e+00 : f32
    %16 = vector.broadcast %cst_12 : f32 to vector<128x128xf32>
    %17 = arith.subf %15, %16 : vector<128x128xf32>
    %18 = arith.extf %3 : vector<128x128xbf16> to vector<128x128xf32>
    %19 = arith.addf %17, %18 : vector<128x128xf32>
    %20 = tpu.reciprocal %15 : vector<128x128xf32> -> vector<128x128xf32>
    %21 = arith.mulf %12, %20 : vector<128x128xf32>
    %cst_13 = arith.constant 1.000000e+00 : f32
    %22 = vector.broadcast %cst_13 : f32 to vector<128x128xf32>
    %23 = arith.subf %12, %22 : vector<128x128xf32>
    %cst_14 = arith.constant 1.000000e+00 : f32
    %24 = vector.broadcast %cst_14 : f32 to vector<128x128xf32>
    %25 = arith.maximumf %19, %24 : vector<128x128xf32>
    %26 = tpu.reciprocal %25 : vector<128x128xf32> -> vector<128x128xf32>
    %27 = arith.mulf %23, %26 : vector<128x128xf32>
    %28 = arith.subf %21, %27 : vector<128x128xf32>
    %cst_15 = arith.constant 0.000000e+00 : f32
    %29 = vector.broadcast %cst_15 : f32 to vector<128x128xf32>
    %30 = arith.subf %29, %1 : vector<128x128xf32>
    %cst_16 = arith.constant 0.000000e+00 : f32
    %31 = vector.broadcast %cst_16 : f32 to vector<128x128xf32>
    %32 = arith.maximumf %30, %31 : vector<128x128xf32>
    %33 = arith.mulf %32, %28 : vector<128x128xf32>
    %34 = vector.shape_cast %33 : vector<128x128xf32> to vector<16x8x128xf32>
    %cst_17 = arith.constant dense<0.000000e+00> : vector<8x128xf32>
    %35 = vector.multi_reduction <add>, %34, %cst_17 [0] : vector<16x8x128xf32> to vector<8x128xf32>
    %36 = vector.shape_cast %35 : vector<8x128xf32> to vector<1x1x8x128xf32>
    %c0_18 = arith.constant 0 : index
    %c0_19 = arith.constant 0 : index
    %c0_20 = arith.constant 0 : index
    %c0_21 = arith.constant 0 : index
    %37 = vector.load %arg7[%c0_18, %c0_19, %c0_20, %c0_21] : memref<1x1x8x128xf32, #tpu.memory_space<vmem>>, vector<1x1x8x128xf32>
    tpu.vector_store %arg7[%c0_18, %c0_19, %c0_20, %c0_21], %36 {strides = array<i32>} : memref<1x1x8x128xf32, #tpu.memory_space<vmem>>, vector<1x1x8x128xf32>,
    return
  }
  func.func @transform_0(%arg0: i32, %arg1: i32) -> (i32, i32) {
    %c0_i32 = arith.constant 0 : i32
    %c0_i32_0 = arith.constant 0 : i32
    %c0_i32_1 = arith.constant 0 : i32
    return %c0_i32, %c0_i32_0 : i32, i32
  }
  func.func @transform_1(%arg0: i32, %arg1: i32) -> (i32, i32) {
    %c0_i32 = arith.constant 0 : i32
    %c0_i32_0 = arith.constant 0 : i32
    %c0_i32_1 = arith.constant 0 : i32
    return %c0_i32, %c0_i32_0 : i32, i32
  }
  func.func @transform_2(%arg0: i32, %arg1: i32) -> (i32, i32, i32) {
    %c0_i32 = arith.constant 0 : i32
    %c0_i32_0 = arith.constant 0 : i32
    return %arg0, %arg1, %c0_i32 : i32, i32, i32
  }
  func.func @transform_3(%arg0: i32, %arg1: i32) -> (i32, i32, i32) {
    %c0_i32 = arith.constant 0 : i32
    %c0_i32_0 = arith.constant 0 : i32
    return %arg0, %arg1, %c0_i32 : i32, i32, i32
  }
  func.func @transform_4(%arg0: i32, %arg1: i32) -> (i32, i32, i32) {
    %c0_i32 = arith.constant 0 : i32
    %c0_i32_0 = arith.constant 0 : i32
    return %arg0, %arg1, %c0_i32 : i32, i32, i32
  }
  func.func @transform_5(%arg0: i32, %arg1: i32) -> (i32, i32, i32, i32) {
    %c0_i32 = arith.constant 0 : i32
    %c0_i32_0 = arith.constant 0 : i32
    %c0_i32_1 = arith.constant 0 : i32
    return %arg0, %arg1, %c0_i32, %c0_i32_0 : i32, i32, i32, i32
  }
}

</mosaic_0001>

<bundles_post_ra>
// kernel: lovasz_hinge_loss.1
= control target key start
LH: loop header
LB: loop body
LE: loop exit
PB: predicated region body
PF: predicated region fallthrough
CT: control target
= control target key end

     0   :  { %s1745_s18 = smov 0   ;;  %s1747_s19 = smov 0   ;;  %s3022_s0 = inlined_call_operand.vmem [shape: bf16[128,128], index: 0, kind: input, shape index: {}]   ;;  %s3023_s1 = inlined_call_operand.vmem [shape: f32[128,128], index: 1, kind: input, shape index: {}]   ;;  %s3024_s2 = inlined_call_operand.vmem [shape: f32[2,128,128], index: 2, kind: input, shape index: {}]   ;;  %s3025_s3 = inlined_call_operand.vmem [shape: bf16[2,128,128], index: 3, kind: input, shape index: {}]   ;;  %s3026_s4 = inlined_call_operand.vmem [shape: f32[2,128,1], index: 4, kind: input, shape index: {}]   ;;  %s3027_s5 = inlined_call_operand.vmem [shape: f32[2,1,8,128], index: 5, kind: output, shape index: {}]  }
   0x1   :  { %s1749_s20 = smov 0  }
   0x2 LB: > { %s27_s21 = sadd.s32 1, %s1708_s19  ;;  %p1444_p0 = scmp.ge.s32.totalorder %s1712_s20, 1  ;;  %s1712_s20 = sphi %s1749_s20, %s15_s20   ;;  %s1708_s19 = sphi %s1747_s19, %s3157_s19   ;;  %s1704_s18 = sphi %s1745_s18, %s3156_s18  }
   0x3   : > { %p29_p1 = scmp.ge.s32.totalorder %s27_s21, 2  ;;  %p242_p2 = scmp.lt.s32.totalorder %s1712_s20, 3 }
   0x5   : > { %s3159_s21 = smov (%p29_p1, %s27_s21), 0  ;;  %p243_p3 = pnand %p1444_p0, %p242_p2 }
   0x7   : > { %246 = sbr.rel (%p243_p3) target bundleno = 334 (0x14e), region = 40 }
   0xc   : > { %v1568_v0 = vld [vmem:[%s3022_s0 + $0x38] sm:$0xff]  ;;  %p295_p4 = scmp.lt.s32.totalorder %s1704_s18, 1  ;;  %v1714_v1 = vmov 0   ;;  %v1567_v2 = vld [vmem:[%s3022_s0 + $0x30] sm:$0xff]  ;;  %v1566_v3 = vld [vmem:[%s3022_s0 + $0x28] sm:$0xff] }
   0xd   : > { %1618 = vset.pattern.permute.xlu0 %v1714_v1  ;;  %1619 = vset.pattern.permute.xlu1 %v1714_v1  ;;  %v1565_v6 = vld [vmem:[%s3022_s0 + $0x20] sm:$0xff]  ;;  %v1564_v10 = vld [vmem:[%s3022_s0 + $0x18] sm:$0xff]  ;;  %v1563_v11 = vld [vmem:[%s3022_s0 + $0x10] sm:$0xff] }
   0xe   : > { %491 = vmatpush.bf16.msra.mxu0 %v1568_v0  ;;  %1569 = vmatpush.bf16.msra.mxu1 %v1568_v0  ;;  %s3161_s18 = smov (!%p295_p4, %s1704_s18), 1  ;;  %v1562_v15 = vld [vmem:[%s3022_s0 + $0x8] sm:$0xff]  ;;  %v1561_v17 = vld [vmem:[%s3022_s0] sm:$0xff]  ;;  %v1884_v63 = vld [vmem:[%s3023_s1 + $0x10] sm:$0xff] }
   0xf   : > { %1570 = vmatpush.bf16.msra.mxu2 %v1568_v0  ;;  %1571 = vmatpush.bf16.msra.mxu3 %v1568_v0  ;;  %s1550_s26 = sshll.u32 %s3161_s18, 7  ;;  %s1551_s13 = sshll.u32 %s3161_s18, 6  ;;  %v1834_v39 = vld [vmem:[%s3023_s1] sm:$0xff]  ;;  %v1879_v62 = vld [vmem:[%s3023_s1 + $0x8] sm:$0xff]  ;;  %3030 = vst [vmem:[#allocation2_spill] sm:$0xff] %v1884_v63 }
  0x10   : > { %1620 = vset.pattern.permute.xlu2 %v1714_v1  ;;  %s1777_s29 = scalar_lea.vmem %s3026_s4, %s1550_s26  ;;  %s1806_s22 = scalar_lea.vmem %s3025_s3, %s1551_s13  ;;  %v1839_v40 = vld [vmem:[%s3023_s1 + $0x20] sm:$0xff]  ;;  %v1874_v61 = vadd.f32 -1.0, %v1834_v39 }
  0x11   : > { %v363_v4 = vld [vmem:[%s1777_s29] sm:$0xff]  ;;  %v365_v5 = vld [vmem:[%s1777_s29 + $0x10] sm:$0xff]  ;;  %v364_v8 = vld [vmem:[%s1777_s29 + $0x8] sm:$0xff]  ;;  %s1871_s9 = scalar_lea.vmem %s3024_s2, %s1550_s26  ;;  %s1451_s30 = sshll.u32 %s3161_s18, 3 }
  0x12   : > { %492 = vmatpush.bf16.msra.mxu0 %v1567_v2  ;;  %1572 = vmatpush.bf16.msra.mxu1 %v1567_v2  ;;  %v367_v7 = vld [vmem:[%s1777_s29 + $0x20] sm:$0xff]  ;;  %v366_v9 = vld [vmem:[%s1777_s29 + $0x18] sm:$0xff]  ;;  %v368_v12 = vld [vmem:[%s1777_s29 + $0x28] sm:$0xff]  ;;  %s330_s8 = scalar_lea.vmem %s3027_s5, %s1451_s30 }
  0x13   : > { %1573 = vmatpush.bf16.msra.mxu2 %v1567_v2  ;;  %1574 = vmatpush.bf16.msra.mxu3 %v1567_v2  ;;  %v369_v13 = vld [vmem:[%s1777_s29 + $0x30] sm:$0xff]  ;;  %v370_v14 = vld [vmem:[%s1777_s29 + $0x38] sm:$0xff]  ;;  %v371_v16 = vld [vmem:[%s1777_s29 + $0x40] sm:$0xff] }
  0x14   : > { %577 = vperm.xlu0 %1618, %v363_v4   ;;  %587 = vperm.xlu1 %1619, %v365_v5   ;;  %v1553_v18 = vld [vmem:[%s1806_s22] sm:$0xff]  ;;  %v1555_v19 = vld [vmem:[%s1806_s22 + $0x10] sm:$0xff]  ;;  %v372_v20 = vld [vmem:[%s1777_s29 + $0x48] sm:$0xff] }
  0x15   : > { %597 = vperm.xlu2 %1620, %v367_v7   ;;  %v373_v21 = vld [vmem:[%s1777_s29 + $0x50] sm:$0xff]  ;;  %v1557_v22 = vld [vmem:[%s1806_s22 + $0x20] sm:$0xff]  ;;  %v374_v24 = vld [vmem:[%s1777_s29 + $0x58] sm:$0xff] }
  0x16   : > { %493 = vmatpush.bf16.msra.mxu0 %v1566_v3  ;;  %1575 = vmatpush.bf16.msra.mxu1 %v1566_v3  ;;  %v1559_v23 = vld [vmem:[%s1806_s22 + $0x30] sm:$0xff]  ;;  %v375_v25 = vld [vmem:[%s1777_s29 + $0x60] sm:$0xff]  ;;  %v376_v26 = vld [vmem:[%s1777_s29 + $0x68] sm:$0xff] }
  0x17   : > { %1576 = vmatpush.bf16.msra.mxu2 %v1566_v3  ;;  %1577 = vmatpush.bf16.msra.mxu3 %v1566_v3  ;;  %v377_v27 = vld [vmem:[%s1777_s29 + $0x70] sm:$0xff]  ;;  %v1554_v28 = vld [vmem:[%s1806_s22 + $0x8] sm:$0xff]  ;;  %v1556_v29 = vld [vmem:[%s1806_s22 + $0x18] sm:$0xff]  ;;  %v1892_v3 = vadd.f32 -1.0, %v1879_v62 }
  0x18   : > { %v378_v30 = vld [vmem:[%s1777_s29 + $0x78] sm:$0xff]  ;;  %v1558_v31 = vld [vmem:[%s1806_s22 + $0x28] sm:$0xff]  ;;  %v1844_v44 = vld [vmem:[%s1806_s22] sm:$0xff]  }
  0x19   : > { %v1560_v32 = vld [vmem:[%s1806_s22 + $0x38] sm:$0xff]  ;;  %v1849_v46 = vld [vmem:[%s1806_s22 + $0x10] sm:$0xff]   ;;  %v1854_v49 = vld [vmem:[%s3023_s1 + $0x40] sm:$0xff]  ;;  %v703_v51 = vunpack.c.l.bf16 %v1844_v44 }
  0x1a   : > { %494 = vmatpush.bf16.msra.mxu0 %v1565_v6  ;;  %1578 = vmatpush.bf16.msra.mxu1 %v1565_v6  ;;  %v707_v53 = vunpack.c.l.bf16 %v1849_v46  ;;  %v1889_v1 = vld [vmem:[%s1806_s22 + $0x20] sm:$0xff]   ;;  %v546_v4 = vld [vmem:[%s3023_s1 + $0x30] sm:$0xff]  ;;  %v1900_v5 = vld [vmem:[%s3023_s1 + $0x28] sm:$0xff] }
  0x1b   : > { %1579 = vmatpush.bf16.msra.mxu2 %v1565_v6  ;;  %1580 = vmatpush.bf16.msra.mxu3 %v1565_v6  ;;  %v1905_v6 = vld [vmem:[%s3023_s1 + $0x60] sm:$0xff] }
  0x1c   : > { %582 = vperm.xlu0 %1618, %v364_v8   ;;  %592 = vperm.xlu1 %1619, %v366_v9   ;;  %v1913_v9 = vadd.f32 -1.0, %v1884_v63 }
  0x1d   : > { %602 = vperm.xlu2 %1620, %v368_v12   ;;  %v543_v12 = vld [vmem:[%s3023_s1 + $0x18] sm:$0xff] }
  0x1e   : > { %495 = vmatpush.bf16.msra.mxu0 %v1564_v10  ;;  %1581 = vmatpush.bf16.msra.mxu1 %v1564_v10  ;;  %3031 = vst [vmem:[#allocation3_spill] sm:$0xff] %v1913_v9 }
  0x1f   : > { %1582 = vmatpush.bf16.msra.mxu2 %v1564_v10  ;;  %1583 = vmatpush.bf16.msra.mxu3 %v1564_v10  ;;  %v1916_v10 = vadd.f32 -1.0, %v1839_v40 }
  0x22   : > { %496 = vmatpush.bf16.msra.mxu0 %v1563_v11  ;;  %1584 = vmatpush.bf16.msra.mxu1 %v1563_v11 }
  0x23   : > { %1585 = vmatpush.bf16.msra.mxu2 %v1563_v11  ;;  %1586 = vmatpush.bf16.msra.mxu3 %v1563_v11  ;;  %v1918_v11 = vadd.f32 -1.0, %v546_v4 }
  0x24   : > { %607 = vperm.xlu0 %1618, %v369_v13   ;;  %612 = vperm.xlu1 %1619, %v370_v14   ;;  %v1926_v13 = vld [vmem:[%s3023_s1 + $0x48] sm:$0xff] }
  0x25   : > { %617 = vperm.xlu2 %1620, %v371_v16   ;;  %3032 = vst [vmem:[#allocation4_spill] sm:$0xff] %v1918_v11  ;;  %v1932_v16 = vadd.f32 -1.0, %v1900_v5 }
  0x26   : > { %497 = vmatpush.bf16.msra.mxu0 %v1562_v15  ;;  %1587 = vmatpush.bf16.msra.mxu1 %v1562_v15 }
  0x27   : > { %1588 = vmatpush.bf16.msra.mxu2 %v1562_v15  ;;  %1589 = vmatpush.bf16.msra.mxu3 %v1562_v15  ;;  %v1929_v15 = vadd.f32 -1.0, %v543_v12 }
  0x29   : > { %3033 = vst [vmem:[#allocation5_spill] sm:$0xff] %v1929_v15 }
  0x2a   : > { %498 = vmatpush.bf16.msra.mxu0 %v1561_v17  ;;  %1590 = vmatpush.bf16.msra.mxu1 %v1561_v17 }
  0x2b   : > { %1591 = vmatpush.bf16.msra.mxu2 %v1561_v17  ;;  %1592 = vmatpush.bf16.msra.mxu3 %v1561_v17  ;;  %v547_v17 = vld [vmem:[%s3023_s1 + $0x38] sm:$0xff] }
  0x2c   : > { %622 = vperm.xlu0 %1618, %v372_v20   ;;  %627 = vperm.xlu1 %1619, %v373_v21   ;;  %v711_v20 = vunpack.c.l.bf16 %v1889_v1 }
  0x2d   : > { %499 = vmatmul.bf16.vlgmr.msra.gmra.mxu0 %v1553_v18  ;;  %509 = vmatmul.bf16.vlgmr.msra.gmra.mxu1 %v1555_v19  ;;  %v331_v18 = vld [vmem:[%s1871_s9] sm:$0xff] }
  0x2e   : > { %519 = vmatmul.bf16.vlgmr.msra.gmra.mxu2 %v1557_v22  ;;  %529 = vmatmul.bf16.vlgmr.msra.gmra.mxu3 %v1559_v23  ;;  %v335_v19 = vld [vmem:[%s1871_s9 + $0x20] sm:$0xff]  ;;  %v1947_v23 = vadd.f32 -1.0, %v1926_v13 }
  0x2f   : > { %632 = vperm.xlu2 %1620, %v374_v24   ;;  %v1949_v24 = vadd.f32 -1.0, %v547_v17 }
  0x31   : > { %3034 = vst [vmem:[#allocation6_spill] sm:$0xff] %v1949_v24 }
  0x34   : > { %637 = vperm.xlu0 %1618, %v375_v25   ;;  %642 = vperm.xlu1 %1619, %v376_v26  }
  0x37   : > { %647 = vperm.xlu2 %1620, %v377_v27   ;;  %v1956_v27 = vadd.f32 -1.0, %v1854_v49 }
  0x3c   : > { %652 = vperm.xlu0 %1618, %v378_v30  }
  0x3d   : > { %504 = vmatmul.bf16.gmra.mxu0 %v1554_v28  ;;  %514 = vmatmul.bf16.gmra.mxu1 %v1556_v29  ;;  %v1959_v28 = vadd.f32 -1.0, %v1905_v6  ;;  %v551_v29 = vld [vmem:[%s3023_s1 + $0x58] sm:$0xff] }
  0x3e   : > { %524 = vmatmul.bf16.gmra.mxu2 %v1558_v31  ;;  %534 = vmatmul.bf16.gmra.mxu3 %v1560_v32  ;;  %v1966_v31 = vld [vmem:[%s1806_s22 + $0x30] sm:$0xff]  }
  0x6f   : > { %v598_v35 = vpop.permute.xlu2 %597 }
  0x70   : > { %v659_v43 = vadd.f32 %v598_v35, %v1839_v40 }
  0x77   : > { %v603_v38 = vpop.permute.xlu2 %602 }
  0x78   : > { %v1944_v22 = vadd.f32 %v603_v38, %v1900_v5  ;;  %v1267_v38 = vsub.f32 0.0, %v335_v19 }
  0x7f   : > { %v618_v54 = vpop.permute.xlu2 %617 }
  0x80   : > { %v663_v56 = vadd.f32 %v618_v54, %v1854_v49 }
  0x86   : > { %v578_v33 = vpop.permute.xlu0 %577  ;;  %v588_v36 = vpop.permute.xlu1 %587 }
  0x87   : > { %v655_v42 = vadd.f32 %v578_v33, %v1834_v39  ;;  %v1953_v26 = vadd.f32 %v588_v36, %v1884_v63  ;;  %v1263_v36 = vsub.f32 0.0, %v331_v18  ;;  %v2016_v18 = vmax.f32 %v1267_v38, 0.0  ;;  %v2030_v38 = vld [vmem:[%s3023_s1 + $0x78] sm:$0xff] }
  0x8e   : > { %v1827_v34 = vpop.permute.xlu0 %582  ;;  %v593_v41 = vpop.permute.xlu1 %592 }
  0x8f   : > { %v1970_v33 = vadd.f32 %v1827_v34, %v1879_v62  ;;  %v1972_v35 = vadd.f32 %v593_v41, %v543_v12  ;;  %v633_v41 = vpop.permute.xlu2 %632  ;;  %v2010_v12 = vmax.f32 %v1263_v36, 0.0 }
  0x91   : > { %3035 = vst [vmem:[#allocation7_spill] sm:$0xff] %v1972_v35 }
  0x96   : > { %v1829_v37 = vpop.permute.xlu0 %607  ;;  %v613_v58 = vpop.permute.xlu1 %612 }
  0x9e   : > { %v1846_v45 = vpop.permute.xlu0 %622  ;;  %v628_v54 = vpop.permute.xlu1 %627 }
  0xa6   : > { %v638_v14 = vpop.permute.xlu0 %637 }
  0xa7   : > { %v667_v25 = vadd.f32 %v638_v14, %v1905_v6 }
  0xaa   : > { %v500_v47 = vpop.f32.mrf.mxu0  ;;  %v510_v48 = vpop.f32.mrf.mxu1 }
  0xab   : > { %v1856_v50 = vsub.f32 %v655_v42, %v500_v47  ;;  %v1859_v52 = vsub.f32 %v659_v43, %v510_v48  ;;  %v1977_v42 = vld [vmem:[%s3023_s1 + $0x50] sm:$0xff]  ;;  %v1982_v47 = vadd.f32 %v1829_v37, %v546_v4  ;;  %v1984_v48 = vadd.f32 %v613_v58, %v547_v17 }
  0xac   : > { %3036 = vst [vmem:[#allocation8_spill] sm:$0xff] %v1977_v42  ;;  %v2000_v58 = vadd.f32 %v1846_v45, %v1926_v13 }
  0xad   : > { %v1516_v55 = vadd.f32 -1.0, %v1856_v50  ;;  %v1520_v57 = vadd.f32 -1.0, %v1859_v52  ;;  %1621 = vrcp.f32 %v1856_v50  ;;  %3037 = vst [vmem:[#allocation9_spill] sm:$0xff] %v1984_v48  ;;  %v746_v19 = vand.u32 2147483648, %v1856_v50 }
  0xae   : > { %1623 = vrcp.f32 %v1859_v52  ;;  %vm740_vm0 = vweird.f32 %v1856_v50  ;;  %vm796_vm1 = vweird.f32 %v1859_v52 }
  0xaf   : > { %v719_v59 = vadd.f32 %v1516_v55, %v703_v51  ;;  %v723_v60 = vadd.f32 %v1520_v57, %v707_v53  ;;  %v1990_v55 = vadd.f32 %v633_v41, %v551_v29  ;;  %v715_v57 = vunpack.c.l.bf16 %v1966_v31 }
  0xb0   : > { %v744_v41 = vand.u32 2147483647, %v1856_v50 }
  0xb1   : > { %v1886_v0 = vmax.f32 %v719_v59, 1.0  ;;  %v520_v2 = vpop.f32.mrf.mxu2  ;;  %v1908_v7 = vmax.f32 %v723_v60, 1.0  ;;  %v530_v32 = vpop.f32.mrf.mxu3  ;;  %3038 = vst [vmem:[#allocation10_spill] sm:$0xff] %v1990_v55  ;;  %v2005_v60 = vadd.f32 %v628_v54, %v1977_v42  ;;  %v747_v55 = vor.u32 1.1754944e-38, %v746_v19 }
  0xb2   : > { %v1910_v8 = vsub.f32 %v663_v56, %v520_v2  ;;  %v1993_v56 = vsub.f32 %v667_v25, %v530_v32  ;;  %v339_v2 = vld [vmem:[%s1871_s9 + $0x40] sm:$0xff]  ;;  %v2022_v25 = vadd.f32 -1.0, %v1977_v42  ;;  %vm2051_vm3 = vcmp.eq.f32.partialorder %v744_v41, 8.507059e+37 }
  0xb3   : > { %1625 = vrcp.f32 %v1886_v0  ;;  %v1941_v21 = vpop.eup %1621  ;;  %v1271_v32 = vsub.f32 0.0, %v339_v2  ;;  %v800_v2 = vand.u32 2147483647, %v1859_v52  ;;  %vm1012_vm2 = vweird.f32 %v1886_v0 }
  0xb4   : > { %1627 = vrcp.f32 %v1908_v7  ;;  %v1524_v30 = vadd.f32 -1.0, %v1910_v8  ;;  %v1979_v43 = vpop.eup %1623  ;;  %v736_v34 = vmul.f32 %v1941_v21, %v1856_v50  ;;  %3039 = vst [vmem:[#allocation11_spill] sm:$0xff] %v2022_v25  ;;  %v1528_v36 = vadd.f32 -1.0, %v1993_v56 }
  0xb5   : > { %1629 = vrcp.f32 %v1910_v8  ;;  %v792_v14 = vmul.f32 %v1979_v43, %v1859_v52  ;;  %vm741_vm4 = vweird.f32 %v1941_v21  ;;  %vm797_vm5 = vweird.f32 %v1979_v43 }
  0xb6   : > { %v727_v51 = vadd.f32 %v1524_v30, %v711_v20  ;;  %v737_v45 = vsub.f32 1.0, %v736_v34  ;;  %v802_v20 = vand.u32 2147483648, %v1859_v52  ;;  %v2024_v30 = vadd.f32 -1.0, %v551_v29  ;;  %v653_v34 = vpop.permute.xlu0 %652  ;;  %vm2085_vm10 = vmor %vm740_vm0, %vm741_vm4 }
  0xb7   : > { %v793_v29 = vsub.f32 1.0, %v792_v14  ;;  %v2043_v42 = vadd.f32 %v653_v34, %v2030_v38  ;;  %v731_v54 = vadd.f32 %v1528_v36, %v715_v57  ;;  %vm1068_vm6 = vweird.f32 %v1908_v7  ;;  %vm2102_vm12 = vmor %vm796_vm1, %vm797_vm5 }
  0xb8   : > { %v2008_v4 = vmax.f32 %v727_v51, 1.0  ;;  %3040 = vst [vmem:[#allocation12_spill] sm:$0xff] %v2024_v30  ;;  %v738_v15 = vmul.f32 %v1941_v21, %v737_v45  ;;  %v2040_v25 = vor.u32 1.1754944e-38, %v802_v20  ;;  %v1016_v45 = vand.u32 2147483647, %v1886_v0 }
  0xb9   : > { %v1988_v53 = vpop.eup %1625  ;;  %3041 = vst [vmem:[#allocation13_spill] sm:$0xff] %v2043_v42  ;;  %v1018_v20 = vand.u32 2147483648, %v1886_v0  ;;  %v794_v57 = vmul.f32 %v1979_v43, %v793_v29  ;;  %v1072_v41 = vand.u32 2147483647, %v1908_v7  ;;  %v2071_v42 = vmax.f32 %v731_v54, 1.0 }
  0xba   : > { %v1996_v37 = vpop.eup %1627  ;;  %v1008_v59 = vmul.f32 %v1988_v53, %v1886_v0  ;;  %1631 = vrcp.f32 %v2008_v4  ;;  %v739_v34 = vadd.f32 %v1941_v21, %v738_v15  ;;  %vm1013_vm7 = vweird.f32 %v1988_v53 }
  0xbb   : > { %v1064_v17 = vmul.f32 %v1996_v37, %v1908_v7  ;;  %v2035_v24 = vpop.eup %1629  ;;  %1633 = vrcp.f32 %v1993_v56  ;;  %vm2075_vm8 = vcmp.eq.f32.partialorder %v1016_v45, 8.507059e+37  ;;  %vm2079_vm9 = vcmp.eq.f32.partialorder %v800_v2, 8.507059e+37  ;;  %v502_v45 = vpop.f32.mrf.mxu0  ;;  %vm2112_vm14 = vmor %vm1012_vm2, %vm1013_vm7 }
  0xbc   : > { %v1009_v51 = vsub.f32 1.0, %v1008_v59  ;;  %v2046_v59 = vmax.f32 %v1271_v32, 0.0  ;;  %v848_v19 = vmul.f32 %v2035_v24, %v1910_v8  ;;  %v795_v54 = vadd.f32 %v1979_v43, %v794_v57 }
  0xbd   : > { %v1065_v30 = vsub.f32 1.0, %v1064_v17  ;;  %vm1069_vm11 = vweird.f32 %v1996_v37  ;;  %1635 = vrcp.f32 %v2071_v42  ;;  %v1019_v50 = vor.u32 1.1754944e-38, %v1018_v20 }
  0xbe   : > { %v1010_v17 = vmul.f32 %v1988_v53, %v1009_v51  ;;  %v1074_v51 = vand.u32 2147483648, %v1908_v7  ;;  %v849_v35 = vsub.f32 1.0, %v848_v19  ;;  %v743_v19 = vsel %vm2085_vm10, %v1941_v21, %v739_v34  ;;  %v512_v34 = vpop.f32.mrf.mxu1  ;;  %vm2129_vm0 = vmor %vm1068_vm6, %vm1069_vm11  ;;  %v2260_v21 = vld [vmem:[%s3023_s1 + $0x68] sm:$0xff] }
  0xbf   : > { %v1066_v32 = vmul.f32 %v1996_v37, %v1065_v30  ;;  %vm852_vm13 = vweird.f32 %v1910_v8  ;;  %vm2116_vm15 = vcmp.eq.f32.partialorder %v1072_v41, 8.507059e+37  ;;  %v856_v20 = vand.u32 2147483647, %v1910_v8 }
  0xc0   : > { %v2049_v48 = vpop.eup %1631  ;;  %v1011_v30 = vadd.f32 %v1988_v53, %v1010_v17  ;;  %v1075_v52 = vor.u32 1.1754944e-38, %v1074_v51  ;;  %v850_v41 = vmul.f32 %v2035_v24, %v849_v35  ;;  %vm1124_vm1 = vweird.f32 %v2008_v4 }
  0xc1   : > { %v1120_v36 = vmul.f32 %v2049_v48, %v2008_v4  ;;  %v1067_v17 = vadd.f32 %v1996_v37, %v1066_v32  ;;  %v2093_v2 = vpop.eup %1633  ;;  %v2136_v51 = vsub.f32 %v1970_v33, %v502_v45  ;;  %v748_v63 = vsel %vm2051_vm3, %v747_v55, %v743_v19 }
  0xc2   : > { %vm1125_vm2 = vweird.f32 %v2049_v48  ;;  %v2152_v11 = vsub.f32 %v1944_v22, %v512_v34  ;;  %vm853_vm3 = vweird.f32 %v2035_v24  ;;  %v851_v45 = vadd.f32 %v2035_v24, %v850_v41 }
  0xc3   : > { %v1121_v14 = vsub.f32 1.0, %v1120_v36  ;;  %v858_v36 = vand.u32 2147483648, %v1910_v8  ;;  %v1071_v7 = vsel %vm2129_vm0, %v1996_v37, %v1067_v17  ;;  %v1517_v33 = vadd.f32 -1.0, %v2136_v51  ;;  %v2154_v55 = vpop.eup %1635  ;;  %vm2175_vm4 = vmor %vm1124_vm1, %vm1125_vm2  ;;  %v343_v8 = vld [vmem:[%s1871_s9 + $0x60] sm:$0xff] }
  0xc4   : > { %v1128_v37 = vand.u32 2147483647, %v2008_v4  ;;  %v1076_v17 = vsel %vm2116_vm15, %v1075_v52, %v1071_v7  ;;  %v3058_v19 = vunpack.c.h.bf16 %v1844_v44  ;;  %1637 = vrcp.f32 %v2136_v51  ;;  %vm2193_vm5 = vmor %vm852_vm13, %vm853_vm3 }
  0xc5   : > { %v1122_v32 = vmul.f32 %v2049_v48, %v1121_v14  ;;  %v1015_v14 = vsel %vm2112_vm14, %v1988_v53, %v1011_v30  ;;  %v799_v53 = vsel %vm2102_vm12, %v1979_v43, %v795_v54  ;;  %v904_v30 = vmul.f32 %v2093_v2, %v1993_v56 }
  0xc6   : > { %v1020_v43 = vsel %vm2075_vm8, %v1019_v50, %v1015_v14  ;;  %v1130_v54 = vand.u32 2147483648, %v2008_v4  ;;  %v720_v22 = vadd.f32 %v1517_v33, %v3058_v19  ;;  %v959_v57 = vmul.f32 %v748_v63, %v1834_v39 }
  0xc7   : > { %v1123_v35 = vadd.f32 %v2049_v48, %v1122_v32  ;;  %v804_v29 = vsel %vm2079_vm9, %v2040_v25, %v799_v53  ;;  %v859_v50 = vor.u32 1.1754944e-38, %v858_v36  ;;  %v905_v9 = vsub.f32 1.0, %v904_v30 }
  0xc8   : > { %v1176_v39 = vmul.f32 %v2154_v55, %v2071_v42  ;;  %v2184_v63 = vmax.f32 %v720_v22, 1.0  ;;  %v1521_v25 = vadd.f32 -1.0, %v2152_v11  ;;  %v1231_v15 = vmul.f32 %v1874_v61, %v1020_v43 }
  0xc9   : > { %v1127_v44 = vsel %vm2175_vm4, %v2049_v48, %v1123_v35  ;;  %v1235_v4 = vmul.f32 %v1916_v10, %v1076_v17  ;;  %vm1129_vm6 = vcmp.eq.f32.partialorder %v1128_v37, 8.507059e+37  ;;  %v1131_v48 = vor.u32 1.1754944e-38, %v1130_v54  ;;  %v332_v17 = vld [vmem:[%s1871_s9 + $0x8] sm:$0xff] }
  0xca   : > { %v855_v52 = vsel %vm2193_vm5, %v2035_v24, %v851_v45  ;;  %v912_v36 = vand.u32 2147483647, %v1993_v56  ;;  %v914_v61 = vand.u32 2147483648, %v1993_v56  ;;  %1639 = vrcp.f32 %v2184_v63  ;;  %v2208_v41 = vpop.eup %1637 }
  0xcb   : > { %v963_v10 = vmul.f32 %v804_v29, %v1839_v40  ;;  %v1132_v34 = vsel %vm1129_vm6, %v1131_v48, %v1127_v44  ;;  %v3063_v14 = vunpack.c.h.bf16 %v1849_v46  ;;  %1641 = vrcp.f32 %v2152_v11  ;;  %v643_v48 = vpop.permute.xlu1 %642 }
  0xcc   : > { %vm857_vm7 = vcmp.eq.f32.partialorder %v856_v20, 8.507059e+37  ;;  %v906_v24 = vmul.f32 %v2093_v2, %v905_v9  ;;  %vm908_vm8 = vweird.f32 %v1993_v56  ;;  %v1177_v53 = vsub.f32 1.0, %v1176_v39 }
  0xcd   : > { %v724_v0 = vadd.f32 %v1521_v25, %v3063_v14  ;;  %v1247_v7 = vsub.f32 %v959_v57, %v1231_v15  ;;  %v1251_v30 = vsub.f32 %v963_v10, %v1235_v4  ;;  %v860_v35 = vsel %vm857_vm7, %v859_v50, %v855_v52 }
  0xce   : > { %v1239_v33 = vmul.f32 %v1956_v27, %v1132_v34  ;;  %vm2215_vm9 = vcmp.eq.f32.partialorder %v912_v36, 8.507059e+37  ;;  %v915_v43 = vor.u32 1.1754944e-38, %v914_v61  ;;  %v1275_v37 = vsub.f32 0.0, %v343_v8  ;;  %v522_v61 = vpop.f32.mrf.mxu2 }
  0xcf   : > { %v2212_v40 = vmax.f32 %v724_v0, 1.0  ;;  %v1184_v20 = vand.u32 2147483647, %v2071_v42  ;;  %v1186_v54 = vand.u32 2147483648, %v2071_v42  ;;  %v750_v45 = vmul.f32 %v2208_v41, %v2136_v51  ;;  %v532_v0 = vpop.f32.mrf.mxu3 }
  0xd0   : > { %v2225_v19 = vpop.eup %1639  ;;  %v967_v27 = vmul.f32 %v860_v35, %v1854_v49  ;;  %v907_v22 = vadd.f32 %v2093_v2, %v906_v24  ;;  %vm909_vm10 = vweird.f32 %v2093_v2  ;;  %v1178_v57 = vmul.f32 %v2154_v55, %v1177_v53 }
  0xd1   : > { %1643 = vrcp.f32 %v2212_v40  ;;  %v2231_v29 = vpop.eup %1641  ;;  %v2234_v50 = vmul.f32 %v2010_v12, %v1247_v7  ;;  %v2237_v32 = vmul.f32 %v2016_v18, %v1251_v30  ;;  %v2240_v9 = vadd.f32 -1.0, %v2030_v38  ;;  %vm2249_vm12 = vmor %vm908_vm8, %vm909_vm10 }
  0xd2   : > { %v1022_v49 = vmul.f32 %v2225_v19, %v2184_v63  ;;  %v1255_v44 = vsub.f32 %v967_v27, %v1239_v33  ;;  %vm1180_vm11 = vweird.f32 %v2071_v42  ;;  %v2245_v39 = vmax.f32 %v1275_v37, 0.0 }
  0xd3   : > { %v1264_v25 = vsub.f32 0.0, %v332_v17  ;;  %vm2253_vm13 = vcmp.eq.f32.partialorder %v1184_v20, 8.507059e+37  ;;  %v1187_v38 = vor.u32 1.1754944e-38, %v1186_v54  ;;  %v751_v15 = vsub.f32 1.0, %v750_v45 }
  0xd4   : > { %v1023_v4 = vsub.f32 1.0, %v1022_v49  ;;  %v911_v56 = vsel %vm2249_vm12, %v2093_v2, %v907_v22  ;;  %v1179_v52 = vadd.f32 %v2154_v55, %v1178_v57  ;;  %vm1181_vm14 = vweird.f32 %v2154_v55 }
  0xd5   : > { %v806_v36 = vmul.f32 %v2231_v29, %v2152_v11  ;;  %vm754_vm15 = vweird.f32 %v2136_v51  ;;  %v758_v34 = vand.u32 2147483647, %v2136_v51  ;;  %v760_v8 = vand.u32 2147483648, %v2136_v51  ;;  %vm2287_vm0 = vmor %vm1180_vm11, %vm1181_vm14 }
  0xd6   : > { %v1024_v14 = vmul.f32 %v2225_v19, %v1023_v4  ;;  %v2276_v2 = vmul.f32 %v2046_v59, %v1255_v44  ;;  %v2278_v24 = vmax.f32 %v1264_v25, 0.0  ;;  %v668_v7 = vadd.f32 %v643_v48, %v2260_v21  ;;  %v336_v25 = vld [vmem:[%s1871_s9 + $0x28] sm:$0xff] }
  0xd7   : > { %v2269_v10 = vpop.eup %1643  ;;  %v916_v30 = vsel %vm2215_vm9, %v915_v43, %v911_v56  ;;  %v752_v33 = vmul.f32 %v2208_v41, %v751_v15  ;;  %v2293_v59 = vsub.f32 %v2000_v58, %v522_v61  ;;  %v712_v37 = vunpack.c.h.bf16 %v1889_v1 }
  0xd8   : > { %v1078_v53 = vmul.f32 %v2269_v10, %v2212_v40  ;;  %v1183_v20 = vsel %vm2287_vm0, %v2154_v55, %v1179_v52  ;;  %v1030_v46 = vand.u32 2147483647, %v2184_v63  ;;  %v807_v43 = vsub.f32 1.0, %v806_v36 }
  0xd9   : > { %v2300_v54 = vsub.f32 %v668_v7, %v532_v0  ;;  %vm2302_vm1 = vcmp.eq.f32.partialorder %v758_v34, 8.507059e+37  ;;  %v1025_v17 = vadd.f32 %v2225_v19, %v1024_v14  ;;  %vm1027_vm2 = vweird.f32 %v2225_v19 }
  0xda   : > { %v1079_v58 = vsub.f32 1.0, %v1078_v53  ;;  %v1525_v1 = vadd.f32 -1.0, %v2293_v59  ;;  %v761_v45 = vor.u32 1.1754944e-38, %v760_v8  ;;  %v1032_v55 = vand.u32 2147483648, %v2184_v63 }
  0xdb   : > { %1645 = vrcp.f32 %v2293_v59  ;;  %v716_v27 = vunpack.c.h.bf16 %v1966_v31  ;;  %v753_v22 = vadd.f32 %v2208_v41, %v752_v33  ;;  %vm755_vm3 = vweird.f32 %v2208_v41 }
  0xdc   : > { %vm1026_vm4 = vweird.f32 %v2184_v63  ;;  %v728_v57 = vadd.f32 %v1525_v1, %v712_v37  ;;  %v1188_v49 = vsel %vm2253_vm13, %v1187_v38, %v1183_v20  ;;  %v808_v12 = vmul.f32 %v2231_v29, %v807_v43  ;;  %vm2333_vm7 = vmor %vm754_vm15, %vm755_vm3  ;;  %v515_v43 = vpop.f32.mrf.mxu1 }
  0xdd   : > { %vm2317_vm5 = vmor %vm1026_vm4, %vm1027_vm2  ;;  %v814_v15 = vand.u32 2147483647, %v2152_v11  ;;  %v1529_v31 = vadd.f32 -1.0, %v2300_v54  ;;  %vm1031_vm6 = vcmp.eq.f32.partialorder %v1030_v46, 8.507059e+37  ;;  %v1080_v63 = vmul.f32 %v2269_v10, %v1079_v58 }
  0xde   : > { %v1029_v4 = vsel %vm2317_vm5, %v2225_v19, %v1025_v17  ;;  %v2329_v18 = vmax.f32 %v728_v57, 1.0  ;;  %v1033_v48 = vor.u32 1.1754944e-38, %v1032_v55  ;;  %v816_v56 = vand.u32 2147483648, %v2152_v11  ;;  %v340_v17 = vld [vmem:[%s1871_s9 + $0x48] sm:$0xff]  ;;  %v2403_v55 = vld [vmem:[%s3023_s1 + $0x70] sm:$0xff] }
  0xdf   : > { %v732_v52 = vadd.f32 %v1529_v31, %v716_v27  ;;  %1647 = vrcp.f32 %v2300_v54  ;;  %v2340_v36 = vmul.f32 %v1959_v28, %v1188_v49  ;;  %v757_v19 = vsel %vm2333_vm7, %v2208_v41, %v753_v22  ;;  %v2407_v27 = vld [vmem:[%s1806_s22 + $0x8] sm:$0xff]  }
  0xe0   : > { %v1268_v61 = vsub.f32 0.0, %v336_v25  ;;  %1649 = vrcp.f32 %v2329_v18  ;;  %v1034_v34 = vsel %vm1031_vm6, %v1033_v48, %v1029_v4  ;;  %v809_v8 = vadd.f32 %v2231_v29, %v808_v12 }
  0xe1   : > { %v2346_v51 = vpop.eup %1645  ;;  %vm811_vm8 = vweird.f32 %v2231_v29  ;;  %v1086_v14 = vand.u32 2147483647, %v2212_v40  ;;  %v2352_v0 = vmul.f32 %v916_v30, %v1905_v6  ;;  %v1081_v28 = vadd.f32 %v2269_v10, %v1080_v63 }
  0xe2   : > { %vm1083_vm9 = vweird.f32 %v2269_v10  ;;  %v1088_v41 = vand.u32 2147483648, %v2212_v40  ;;  %v762_v53 = vsel %vm2302_vm1, %v761_v45, %v757_v19  ;;  %vm810_vm10 = vweird.f32 %v2152_v11  ;;  %v505_v11 = vpop.f32.mrf.mxu0 }
  0xe3   : > { %vm2360_vm11 = vcmp.eq.f32.partialorder %v814_v15, 8.507059e+37  ;;  %v2364_v35 = vmax.f32 %v732_v52, 1.0  ;;  %v1232_v6 = vmul.f32 %v1892_v3, %v1034_v34  ;;  %vm2367_vm12 = vmor %vm810_vm10, %vm811_vm8  ;;  %v817_v33 = vor.u32 1.1754944e-38, %v816_v56 }
  0xe4   : > { %vm1082_vm13 = vweird.f32 %v2212_v40  ;;  %v862_v37 = vmul.f32 %v2346_v51, %v2293_v59  ;;  %v1259_v46 = vsub.f32 %v2352_v0, %v2340_v36  ;;  %v813_v3 = vsel %vm2367_vm12, %v2231_v29, %v809_v8 }
  0xe5   : > { %v2374_v20 = vpop.eup %1647  ;;  %vm2383_vm14 = vmor %vm1082_vm13, %vm1083_vm9  ;;  %vm2387_vm15 = vcmp.eq.f32.partialorder %v1086_v14, 8.507059e+37  ;;  %v2391_v42 = vmax.f32 %v1268_v61, 0.0  ;;  %v960_v1 = vmul.f32 %v762_v53, %v1879_v62  ;;  %v1089_v45 = vor.u32 1.1754944e-38, %v1088_v41  ;;  %v648_v62 = vpop.permute.xlu2 %647 }
  0xe6   : > { %v2394_v58 = vpop.eup %1649  ;;  %v1085_v29 = vsel %vm2383_vm14, %v2269_v10, %v1081_v28  ;;  %1651 = vrcp.f32 %v2364_v35  ;;  %v2410_v22 = vadd.f32 -1.0, %v2260_v21  ;;  %v2413_v57 = vadd.f32 -1.0, %v2403_v55 }
  0xe7   : > { %v1134_v10 = vmul.f32 %v2394_v58, %v2329_v18  ;;  %v2418_v49 = vsub.f32 %v1953_v26, %v505_v11  ;;  %v1248_v44 = vsub.f32 %v960_v1, %v1232_v6  ;;  %v818_v25 = vsel %vm2360_vm11, %v817_v33, %v813_v3  ;;  %v2460_v3 = vld [vmem:[%s1806_s22 + $0x18] sm:$0xff]  }
  0xe8   : > { %v863_v12 = vsub.f32 1.0, %v862_v37  ;;  %v1272_v15 = vsub.f32 0.0, %v340_v17  ;;  %v1090_v31 = vsel %vm2387_vm15, %v1089_v45, %v1085_v29  ;;  %v918_v4 = vmul.f32 %v2374_v20, %v2300_v54 }
  0xe9   : > { %v1518_v63 = vadd.f32 -1.0, %v2418_v49  ;;  %v705_v38 = vunpack.c.l.bf16 %v2407_v27  ;;  %v2429_v48 = vadd.f32 %v648_v62, %v2403_v55  ;;  %v870_v26 = vand.u32 2147483647, %v2293_v59 }
  0xea   : > { %v872_v56 = vand.u32 2147483648, %v2293_v59  ;;  %1653 = vrcp.f32 %v2418_v49  ;;  %v964_v52 = vmul.f32 %v818_v25, %v1900_v5  ;;  %vm866_vm0 = vweird.f32 %v2293_v59  ;;  %v525_v25 = vpop.f32.mrf.mxu2 }
  0xeb   : > { %v1135_v19 = vsub.f32 1.0, %v1134_v10  ;;  %v721_v61 = vadd.f32 %v1518_v63, %v705_v38  ;;  %v1296_v8 = vmul.f32 %v2278_v24, %v1248_v44  ;;  %v1236_v14 = vmul.f32 %v1932_v16, %v1090_v31  ;;  %v344_v63 = vld [vmem:[%s1871_s9 + $0x68] sm:$0xff] }
  0xec   : > { %v2436_v34 = vpop.eup %1651  ;;  %v864_v28 = vmul.f32 %v2346_v51, %v863_v12  ;;  %v2441_v41 = vmax.f32 %v1272_v15, 0.0  ;;  %v1142_v53 = vand.u32 2147483647, %v2329_v18  ;;  %v1144_v7 = vand.u32 2147483648, %v2329_v18 }
  0xed   : > { %v919_v5 = vsub.f32 1.0, %v918_v4  ;;  %v2445_v6 = vmax.f32 %v721_v61, 1.0  ;;  %vm2447_vm1 = vcmp.eq.f32.partialorder %v870_v26, 8.507059e+37  ;;  %v873_v33 = vor.u32 1.1754944e-38, %v872_v56 }
  0xee   : > { %v926_v24 = vand.u32 2147483647, %v2300_v54  ;;  %v928_v16 = vand.u32 2147483648, %v2300_v54  ;;  %v1136_v37 = vmul.f32 %v2394_v58, %v1135_v19  ;;  %vm1138_vm2 = vweird.f32 %v2329_v18 }
  0xef   : > { %vm922_vm3 = vweird.f32 %v2300_v54  ;;  %v1190_v11 = vmul.f32 %v2436_v34, %v2364_v35  ;;  %1655 = vrcp.f32 %v2445_v6  ;;  %v2465_v17 = vadd.f32 %v1296_v8, %v2234_v50  ;;  %v333_v54 = vld [vmem:[%s1871_s9 + $0x10] sm:$0xff] }
  0xf0   : > { %v2462_v40 = vpop.eup %1653  ;;  %v1252_v1 = vsub.f32 %v964_v52, %v1236_v14  ;;  %v865_v29 = vadd.f32 %v2346_v51, %v864_v28  ;;  %vm867_vm4 = vweird.f32 %v2346_v51  ;;  %vm2469_vm5 = vcmp.eq.f32.partialorder %v1142_v53, 8.507059e+37 }
  0xf1   : > { %v1145_v62 = vor.u32 1.1754944e-38, %v1144_v7  ;;  %v920_v10 = vmul.f32 %v2374_v20, %v919_v5  ;;  %v764_v44 = vmul.f32 %v2462_v40, %v2418_v49  ;;  %vm923_vm6 = vweird.f32 %v2374_v20  ;;  %vm2483_vm7 = vmor %vm866_vm0, %vm867_vm4  ;;  %v2520_v7 = vld [vmem:[%s1806_s22 + $0x28] sm:$0xff]  }
  0xf2   : > { %v929_v50 = vor.u32 1.1754944e-38, %v928_v16  ;;  %v2478_v12 = vsub.f32 %v1982_v47, %v515_v43  ;;  %v709_v15 = vunpack.c.l.bf16 %v2460_v3  ;;  %v1137_v4 = vadd.f32 %v2394_v58, %v1136_v37  ;;  %vm2532_vm12 = vmor %vm922_vm3, %vm923_vm6 }
  0xf3   : > { %vm1139_vm8 = vweird.f32 %v2394_v58  ;;  %vm2490_vm9 = vcmp.eq.f32.partialorder %v926_v24, 8.507059e+37  ;;  %v1191_v26 = vsub.f32 1.0, %v1190_v11  ;;  %v1200_v47 = vand.u32 2147483648, %v2364_v35 }
  0xf4   : > { %v2496_v56 = vmul.f32 %v2391_v42, %v1252_v1  ;;  %v869_v59 = vsel %vm2483_vm7, %v2346_v51, %v865_v29  ;;  %v1522_v52 = vadd.f32 -1.0, %v2478_v12  ;;  %v2503_v19 = vsub.f32 %v2005_v60, %v525_v25  ;;  %vm2512_vm10 = vmor %vm1138_vm2, %vm1139_vm8 }
  0xf5   : > { %v2505_v61 = vpop.eup %1655  ;;  %v921_v8 = vadd.f32 %v2374_v20, %v920_v10  ;;  %v1198_v14 = vand.u32 2147483647, %v2364_v35  ;;  %v765_v28 = vsub.f32 1.0, %v764_v44  ;;  %1657 = vrcp.f32 %v2478_v12 }
  0xf6   : > { %vm1194_vm11 = vweird.f32 %v2364_v35  ;;  %v1276_v60 = vsub.f32 0.0, %v344_v63  ;;  %v1036_v51 = vmul.f32 %v2505_v61, %v2445_v6  ;;  %v725_v53 = vadd.f32 %v1522_v52, %v709_v15 }
  0xf7   : > { %v874_v5 = vsel %vm2447_vm1, %v873_v33, %v869_v59  ;;  %v1141_v18 = vsel %vm2512_vm10, %v2394_v58, %v1137_v4  ;;  %v1192_v24 = vmul.f32 %v2436_v34, %v1191_v26  ;;  %v1201_v16 = vor.u32 1.1754944e-38, %v1200_v47 }
  0xf8   : > { %v772_v11 = vand.u32 2147483647, %v2418_v49  ;;  %v1037_v43 = vsub.f32 1.0, %v1036_v51  ;;  %v2537_v30 = vmax.f32 %v725_v53, 1.0  ;;  %v1526_v33 = vadd.f32 -1.0, %v2503_v19 }
  0xf9   : > { %v925_v58 = vsel %vm2532_vm12, %v2374_v20, %v921_v8  ;;  %vm2543_vm13 = vcmp.eq.f32.partialorder %v1198_v14, 8.507059e+37  ;;  %v766_v29 = vmul.f32 %v2462_v40, %v765_v28  ;;  %v713_v10 = vunpack.c.l.bf16 %v2520_v7 }
  0xfa   : > { %1659 = vrcp.f32 %v2503_v19  ;;  %v1146_v44 = vsel %vm2469_vm5, %v1145_v62, %v1141_v18  ;;  %v2553_v25 = vmax.f32 %v1276_v60, 0.0  ;;  %vm768_vm14 = vweird.f32 %v2418_v49 }
  0xfb   : > { %1661 = vrcp.f32 %v2537_v30  ;;  %v2557_v20 = vpop.eup %1657  ;;  %v968_v15 = vmul.f32 %v874_v5, %v1926_v13  ;;  %v1193_v31 = vadd.f32 %v2436_v34, %v1192_v24  ;;  %vm1195_vm15 = vweird.f32 %v2436_v34  ;;  %v2611_v24 = vld [vmem:[%s1871_s9 + $0x30] sm:$0xff] }
  0xfc   : > { %v1038_v4 = vmul.f32 %v2505_v61, %v1037_v43  ;;  %v930_v45 = vsel %vm2490_vm9, %v929_v50, %v925_v58  ;;  %v774_v62 = vand.u32 2147483648, %v2418_v49  ;;  %v1265_v63 = vsub.f32 0.0, %v333_v54  ;;  %vm2575_vm2 = vmor %vm1194_vm11, %vm1195_vm15 }
  0xfd   : > { %v729_v26 = vadd.f32 %v1526_v33, %v713_v10  ;;  %v1240_v47 = vmul.f32 %v1947_v23, %v1146_v44  ;;  %v767_v59 = vadd.f32 %v2462_v40, %v766_v29  ;;  %vm769_vm0 = vweird.f32 %v2462_v40  ;;  %v2632_v10 = vld [vmem:[%s1806_s22 + $0x38] sm:$0xff]  }
  0xfe   : > { %vm2569_vm1 = vcmp.eq.f32.partialorder %v772_v11, 8.507059e+37  ;;  %v1044_v50 = vand.u32 2147483647, %v2445_v6  ;;  %v1046_v38 = vand.u32 2147483648, %v2445_v6  ;;  %v820_v23 = vmul.f32 %v2557_v20, %v2478_v12  ;;  %vm2599_vm4 = vmor %vm768_vm14, %vm769_vm0 }
  0xff   : > { %v2583_v8 = vmax.f32 %v729_v26, 1.0  ;;  %v2588_v28 = vmul.f32 %v930_v45, %v2260_v21  ;;  %v1197_v35 = vsel %vm2575_vm2, %v2436_v34, %v1193_v31  ;;  %v1039_v42 = vadd.f32 %v2505_v61, %v1038_v4  ;;  %v535_v34 = vpop.f32.mrf.mxu3 }
 0x100   : > { %v2585_v14 = vpop.eup %1659  ;;  %vm1041_vm3 = vweird.f32 %v2505_v61  ;;  %v775_v53 = vor.u32 1.1754944e-38, %v774_v62  ;;  %vm1040_vm5 = vweird.f32 %v2445_v6  ;;  %v2604_v21 = vmax.f32 %v1265_v63, 0.0 }
 0x101   : > { %v2595_v60 = vpop.eup %1661  ;;  %1663 = vrcp.f32 %v2583_v8  ;;  %v1256_v5 = vsub.f32 %v968_v15, %v1240_v47  ;;  %v771_v18 = vsel %vm2599_vm4, %v2462_v40, %v767_v59  ;;  %v876_v37 = vmul.f32 %v2585_v14, %v2503_v19  ;;  %vm2619_vm6 = vmor %vm1040_vm5, %vm1041_vm3  ;;  %v3110_v59 = vld [vmem:[#allocation2_spill] sm:$0xff] }
 0x102   : > { %v1092_v49 = vmul.f32 %v2595_v60, %v2537_v30  ;;  %v1202_v6 = vsel %vm2543_vm13, %v1201_v16, %v1197_v35  ;;  %vm2623_vm7 = vcmp.eq.f32.partialorder %v1044_v50, 8.507059e+37  ;;  %v1047_v40 = vor.u32 1.1754944e-38, %v1046_v38  ;;  %v3126_v50 = vld [vmem:[#allocation9_spill] sm:$0xff] }
 0x103   : > { %v821_v33 = vsub.f32 1.0, %v820_v23  ;;  %v1043_v58 = vsel %vm2619_vm6, %v2505_v61, %v1039_v42  ;;  %v830_v54 = vand.u32 2147483648, %v2478_v12  ;;  %v2635_v16 = vsub.f32 %v2429_v48, %v535_v34  ;;  %v3113_v42 = vld [vmem:[#allocation3_spill] sm:$0xff] }
 0x104   : > { %v1093_v29 = vsub.f32 1.0, %v1092_v49  ;;  %v776_v1 = vsel %vm2569_vm1, %v775_v53, %v771_v18  ;;  %vm824_vm8 = vweird.f32 %v2478_v12  ;;  %v828_v44 = vand.u32 2147483647, %v2478_v12  ;;  %v507_v18 = vpop.f32.mrf.mxu0 }
 0x105   : > { %v1269_v15 = vsub.f32 0.0, %v2611_v24  ;;  %v2643_v31 = vmul.f32 %v2441_v41, %v1256_v5  ;;  %v2646_v61 = vmul.f32 %v2410_v22, %v1202_v6  ;;  %v877_v45 = vsub.f32 1.0, %v876_v37 }
 0x106   : > { %v1094_v4 = vmul.f32 %v2595_v60, %v1093_v29  ;;  %v1048_v62 = vsel %vm2623_vm7, %v1047_v40, %v1043_v58  ;;  %v822_v63 = vmul.f32 %v2557_v20, %v821_v33  ;;  %v1530_v26 = vadd.f32 -1.0, %v2635_v16  ;;  %v3118_v29 = vld [vmem:[#allocation7_spill] sm:$0xff] }
 0x107   : > { %v2649_v48 = vpop.eup %1663  ;;  %v717_v47 = vunpack.c.l.bf16 %v2632_v10  ;;  %v961_v41 = vmul.f32 %v776_v1, %v3110_v59  ;;  %v831_v13 = vor.u32 1.1754944e-38, %v830_v54  ;;  %v1100_v22 = vand.u32 2147483647, %v2537_v30  ;;  %v341_v59 = vld [vmem:[%s1871_s9 + $0x50] sm:$0xff] }
 0x108   : > { %v1148_v52 = vmul.f32 %v2649_v48, %v2583_v8  ;;  %vm2660_vm9 = vcmp.eq.f32.partialorder %v828_v44, 8.507059e+37  ;;  %v1095_v38 = vadd.f32 %v2595_v60, %v1094_v4  ;;  %vm1097_vm10 = vweird.f32 %v2595_v60 }
 0x109   : > { %v1102_v23 = vand.u32 2147483648, %v2537_v30  ;;  %v733_v35 = vadd.f32 %v1530_v26, %v717_v47  ;;  %v1233_v51 = vmul.f32 %v3113_v42, %v1048_v62  ;;  %v878_v53 = vmul.f32 %v2585_v14, %v877_v45  ;;  %v517_v26 = vpop.f32.mrf.mxu1 }
 0x10a   : > { %v1149_v34 = vsub.f32 1.0, %v1148_v52  ;;  %1665 = vrcp.f32 %v2635_v16  ;;  %v823_v5 = vadd.f32 %v2557_v20, %v822_v63  ;;  %vm825_vm11 = vweird.f32 %v2557_v20 }
 0x10b   : > { %vm1096_vm12 = vweird.f32 %v2537_v30  ;;  %vm880_vm13 = vweird.f32 %v2503_v19  ;;  %v884_v49 = vand.u32 2147483647, %v2503_v19  ;;  %v886_v37 = vand.u32 2147483648, %v2503_v19  ;;  %vm2689_vm1 = vmor %vm824_vm8, %vm825_vm11 }
 0x10c   : > { %vm2674_vm14 = vmor %vm1096_vm12, %vm1097_vm10  ;;  %v1150_v6 = vmul.f32 %v2649_v48, %v1149_v34  ;;  %v2681_v11 = vmax.f32 %v733_v35, 1.0  ;;  %vm1101_vm15 = vcmp.eq.f32.partialorder %v1100_v22, 8.507059e+37  ;;  %v1103_v30 = vor.u32 1.1754944e-38, %v1102_v23 }
 0x10d   : > { %v1099_v43 = vsel %vm2674_vm14, %v2595_v60, %v1095_v38  ;;  %vm881_vm0 = vweird.f32 %v2585_v14  ;;  %v1249_v40 = vsub.f32 %v961_v41, %v1233_v51  ;;  %v879_v58 = vadd.f32 %v2585_v14, %v878_v53  ;;  %v3125_v38 = vld [vmem:[#allocation4_spill] sm:$0xff] }
 0x10e   : > { %v1156_v54 = vand.u32 2147483647, %v2583_v8  ;;  %v2696_v1 = vsub.f32 %v3118_v29, %v507_v18  ;;  %v827_v60 = vsel %vm2689_vm1, %v2557_v20, %v823_v5  ;;  %v1151_v44 = vadd.f32 %v2649_v48, %v1150_v6  ;;  %vm2714_vm3 = vmor %vm880_vm13, %vm881_vm0  ;;  %v1685_v53 = vld [vmem:[%s3023_s1 + $0x30] sm:$0xff] }
 0x10f   : > { %vm1153_vm2 = vweird.f32 %v2649_v48  ;;  %v1158_v12 = vand.u32 2147483648, %v2583_v8  ;;  %v1104_v45 = vsel %vm1101_vm15, %v1103_v30, %v1099_v43  ;;  %1667 = vrcp.f32 %v2681_v11  ;;  %v3127_v29 = vld [vmem:[#allocation8_spill] sm:$0xff] }
 0x110   : > { %v2704_v4 = vpop.eup %1665  ;;  %v1519_v62 = vadd.f32 -1.0, %v2696_v1  ;;  %v706_v63 = vunpack.c.h.bf16 %v2407_v27  ;;  %v1285_v47 = vmax.f32 %v1269_v15, 0.0  ;;  %vm2718_vm4 = vcmp.eq.f32.partialorder %v884_v49, 8.507059e+37 }
 0x111   : > { %vm1152_vm5 = vweird.f32 %v2583_v8  ;;  %1669 = vrcp.f32 %v2696_v1  ;;  %v832_v27 = vsel %vm2660_vm9, %v831_v13, %v827_v60  ;;  %v883_v15 = vsel %vm2714_vm3, %v2585_v14, %v879_v58 }
 0x112   : > { %v887_v19 = vor.u32 1.1754944e-38, %v886_v37  ;;  %vm2731_vm6 = vmor %vm1152_vm5, %vm1153_vm2  ;;  %v722_v52 = vadd.f32 %v1519_v62, %v706_v63  ;;  %v1237_v23 = vmul.f32 %v3125_v38, %v1104_v45  ;;  %v932_v13 = vmul.f32 %v2704_v4, %v2635_v16  ;;  %v334_v62 = vld [vmem:[%s1871_s9 + $0x18] sm:$0xff] }
 0x113   : > { %v1155_v8 = vsel %vm2731_vm6, %v2649_v48, %v1151_v44  ;;  %v2742_v35 = vsub.f32 %v3126_v50, %v517_v26  ;;  %v1297_v14 = vmul.f32 %v2604_v21, %v1249_v40  ;;  %vm1157_vm7 = vcmp.eq.f32.partialorder %v1156_v54, 8.507059e+37  ;;  %v3128_v44 = vld [vmem:[#allocation11_spill] sm:$0xff] }
 0x114   : > { %v1159_v42 = vor.u32 1.1754944e-38, %v1158_v12  ;;  %v1273_v51 = vsub.f32 0.0, %v341_v59  ;;  %v965_v34 = vmul.f32 %v1685_v53, %v832_v27  ;;  %v888_v5 = vsel %vm2718_vm4, %v887_v19, %v883_v15 }
 0x115   : > { %v2750_v48 = vmax.f32 %v722_v52, 1.0  ;;  %v710_v18 = vunpack.c.h.bf16 %v2460_v3  ;;  %v2753_v24 = vpop.eup %1667  ;;  %v942_v21 = vand.u32 2147483648, %v2635_v16  ;;  %v1523_v37 = vadd.f32 -1.0, %v2742_v35 }
 0x116   : > { %v1160_v49 = vsel %vm1157_vm7, %v1159_v42, %v1155_v8  ;;  %1671 = vrcp.f32 %v2742_v35  ;;  %v1253_v43 = vsub.f32 %v965_v34, %v1237_v23  ;;  %v933_v30 = vsub.f32 1.0, %v932_v13  ;;  %v527_v8 = vpop.f32.mrf.mxu2 }
 0x117   : > { %v2758_v6 = vpop.eup %1669  ;;  %v1214_v40 = vand.u32 2147483648, %v2681_v11  ;;  %1673 = vrcp.f32 %v2750_v48  ;;  %v2763_v3 = vadd.f32 %v2465_v17, %v1297_v14  ;;  %v2765_v33 = vmax.f32 %v1273_v51, 0.0 }
 0x118   : > { %v940_v58 = vand.u32 2147483647, %v2635_v16  ;;  %v778_v54 = vmul.f32 %v2758_v6, %v2696_v1  ;;  %v2771_v60 = vmul.f32 %v888_v5, %v3127_v29  ;;  %v2774_v12 = vmul.f32 %v3128_v44, %v1160_v49  ;;  %v3131_v49 = vld [vmem:[#allocation10_spill] sm:$0xff] }
 0x119   : > { %v1204_v45 = vmul.f32 %v2753_v24, %v2681_v11  ;;  %v726_v63 = vadd.f32 %v1523_v37, %v710_v18  ;;  %v2779_v17 = vor.u32 1.1754944e-38, %v942_v21  ;;  %v1212_v26 = vand.u32 2147483647, %v2681_v11 }
 0x11a   : > { %v779_v59 = vsub.f32 1.0, %v778_v54  ;;  %v786_v20 = vand.u32 2147483647, %v2696_v1  ;;  %v2783_v41 = vmul.f32 %v1285_v47, %v1253_v43  ;;  %v934_v27 = vmul.f32 %v2704_v4, %v933_v30 }
 0x11b   : > { %v2786_v15 = vor.u32 1.1754944e-38, %v1214_v40  ;;  %v2788_v19 = vmax.f32 %v726_v63, 1.0  ;;  %vm782_vm8 = vweird.f32 %v2696_v1  ;;  %v788_v38 = vand.u32 2147483648, %v2696_v1 }
 0x11c   : > { %v2790_v22 = vpop.eup %1671  ;;  %v780_v52 = vmul.f32 %v2758_v6, %v779_v59  ;;  %v1266_v23 = vsub.f32 0.0, %v334_v62  ;;  %v1257_v47 = vsub.f32 %v2771_v60, %v2774_v12  ;;  %v1205_v50 = vsub.f32 1.0, %v1204_v45  ;;  %v537_v59 = vpop.f32.mrf.mxu3 }
 0x11d   : > { %v1674_v13 = vpop.eup %1673  ;;  %vm783_vm9 = vweird.f32 %v2758_v6  ;;  %v834_v14 = vmul.f32 %v2790_v22, %v2742_v35  ;;  %vm2801_vm10 = vcmp.eq.f32.partialorder %v786_v20, 8.507059e+37  ;;  %v1058_v34 = vand.u32 2147483647, %v2750_v48 }
 0x11e   : > { %v781_v42 = vadd.f32 %v2758_v6, %v780_v52  ;;  %v1050_v53 = vmul.f32 %v1674_v13, %v2750_v48  ;;  %v2808_v5 = vadd.f32 %v2704_v4, %v934_v27  ;;  %1675 = vrcp.f32 %v2788_v19  ;;  %vm2817_vm12 = vmor %vm782_vm8, %vm783_vm9 }
 0x11f   : > { %v835_v18 = vsub.f32 1.0, %v834_v14  ;;  %v2812_v21 = vsub.f32 %v3131_v49, %v527_v8  ;;  %vm937_vm11 = vweird.f32 %v2704_v4  ;;  %v789_v43 = vor.u32 1.1754944e-38, %v788_v38 }
 0x120   : > { %v1051_v30 = vsub.f32 1.0, %v1050_v53  ;;  %vm1054_vm13 = vweird.f32 %v2750_v48  ;;  %v1282_v40 = vmax.f32 %v1266_v23, 0.0  ;;  %v1206_v54 = vmul.f32 %v2753_v24, %v1205_v50 }
 0x121   : > { %vm1209_vm14 = vweird.f32 %v2753_v24  ;;  %v785_v29 = vsel %vm2817_vm12, %v2758_v6, %v781_v42  ;;  %v1060_v44 = vand.u32 2147483648, %v2750_v48  ;;  %v836_v1 = vmul.f32 %v2790_v22, %v835_v18  ;;  %v3136_v42 = vld [vmem:[#allocation13_spill] sm:$0xff] }
 0x122   : > { %vm936_vm15 = vweird.f32 %v2635_v16  ;;  %v1052_v45 = vmul.f32 %v1674_v13, %v1051_v30  ;;  %vm1055_vm0 = vweird.f32 %v1674_v13  ;;  %vm2830_vm1 = vcmp.eq.f32.partialorder %v1058_v34, 8.507059e+37  ;;  %v1686_v48 = vld [vmem:[%s3023_s1 + $0x18] sm:$0xff] }
 0x123   : > { %v842_v63 = vand.u32 2147483647, %v2742_v35  ;;  %vm1208_vm2 = vweird.f32 %v2681_v11  ;;  %v844_v20 = vand.u32 2147483648, %v2742_v35  ;;  %v1527_v6 = vadd.f32 -1.0, %v2812_v21  ;;  %vm1056_vm4 = vmor %vm1054_vm13, %vm1055_vm0  ;;  %v3141_v30 = vld [vmem:[#allocation5_spill] sm:$0xff] }
 0x124   : > { %v714_v27 = vunpack.c.h.bf16 %v2520_v7  ;;  %1677 = vrcp.f32 %v2812_v21  ;;  %v790_v52 = vsel %vm2801_vm10, %v789_v43, %v785_v29  ;;  %v1053_v38 = vadd.f32 %v1674_v13, %v1052_v45  ;;  %v1676_v8 = vpop.eup %1675  ;;  %v338_v29 = vld [vmem:[%s1871_s9 + $0x38] sm:$0xff]  ;;  %vm2900_vm12 = vmor %vm936_vm15, %vm937_vm11  ;;  %v3150_v43 = vld [vmem:[#allocation6_spill] sm:$0xff] }
 0x125   : > { %v837_v23 = vadd.f32 %v2790_v22, %v836_v1  ;;  %vm839_vm3 = vweird.f32 %v2790_v22  ;;  %v2845_v50 = vadd.f32 %v2753_v24, %v1206_v54  ;;  %v1061_v7 = vor.u32 1.1754944e-38, %v1060_v44  ;;  %vm2912_vm0 = vmor %vm1208_vm2, %vm1209_vm14 }
 0x126   : > { %v730_v14 = vadd.f32 %v1527_v6, %v714_v27  ;;  %v2851_v53 = vsub.f32 %v3136_v42, %v537_v59  ;;  %v1057_v51 = vsel %vm1056_vm4, %v1674_v13, %v1053_v38  ;;  %vm838_vm5 = vweird.f32 %v2742_v35 }
 0x127   : > { %vm2854_vm6 = vcmp.eq.f32.partialorder %v842_v63, 8.507059e+37  ;;  %v1106_v18 = vmul.f32 %v1676_v8, %v2788_v19  ;;  %v962_v49 = vmul.f32 %v1686_v48, %v790_v52  ;;  %v1062_v37 = vsel %vm2830_vm1, %v1061_v7, %v1057_v51  ;;  %vm2864_vm7 = vmor %vm838_vm5, %vm839_vm3 }
 0x128   : > { %v845_v13 = vor.u32 1.1754944e-38, %v844_v20  ;;  %v1114_v35 = vand.u32 2147483647, %v2788_v19  ;;  %v1234_v54 = vmul.f32 %v3141_v30, %v1062_v37  ;;  %v841_v44 = vsel %vm2864_vm7, %v2790_v22, %v837_v23 }
 0x129   : > { %v1107_v1 = vsub.f32 1.0, %v1106_v18  ;;  %v2874_v45 = vmax.f32 %v730_v14, 1.0  ;;  %v1116_v62 = vand.u32 2147483648, %v2788_v19  ;;  %v1531_v59 = vadd.f32 -1.0, %v2851_v53 }
 0x12a   : > { %v2876_v63 = vpop.eup %1677  ;;  %v718_v20 = vunpack.c.h.bf16 %v2632_v10  ;;  %1679 = vrcp.f32 %v2851_v53  ;;  %vm2884_vm8 = vcmp.eq.f32.partialorder %v940_v58, 8.507059e+37  ;;  %vm2890_vm9 = vcmp.eq.f32.partialorder %v1212_v26, 8.507059e+37 }
 0x12b   : > { %v1250_v27 = vsub.f32 %v962_v49, %v1234_v54  ;;  %v1108_v52 = vmul.f32 %v1676_v8, %v1107_v1  ;;  %vm1111_vm10 = vweird.f32 %v1676_v8  ;;  %v890_v10 = vmul.f32 %v2876_v63, %v2812_v21 }
 0x12c   : > { %v846_v26 = vsel %vm2854_vm6, %v845_v13, %v841_v44  ;;  %vm1110_vm13 = vweird.f32 %v2788_v19  ;;  %v1270_v38 = vsub.f32 0.0, %v338_v29  ;;  %1681 = vrcp.f32 %v2874_v45 }
 0x12d   : > { %v1298_v16 = vmul.f32 %v1282_v40, %v1250_v27  ;;  %v1109_v7 = vadd.f32 %v1676_v8, %v1108_v52  ;;  %v891_v14 = vsub.f32 1.0, %v890_v10  ;;  %v734_v42 = vadd.f32 %v1531_v59, %v718_v20  ;;  %vm1112_vm11 = vmor %vm1110_vm13, %vm1111_vm10 }
 0x12e   : > { %v939_v19 = vsel %vm2900_vm12, %v2704_v4, %v2808_v5  ;;  %v1211_v51 = vsel %vm2912_vm0, %v2753_v24, %v2845_v50  ;;  %vm1115_vm14 = vcmp.eq.f32.partialorder %v1114_v35, 8.507059e+37  ;;  %v1117_v11 = vor.u32 1.1754944e-38, %v1116_v62  ;;  %v1687_v4 = vld [vmem:[%s3023_s1 + $0x38] sm:$0xff] }
 0x12f   : > { %v1313_v34 = vadd.f32 %v2763_v3, %v1298_v16  ;;  %v1113_v40 = vsel %vm1112_vm11, %v1676_v8, %v1109_v7  ;;  %v892_v18 = vmul.f32 %v2876_v63, %v891_v14  ;;  %v2926_v48 = vmax.f32 %v734_v42, 1.0  ;;  %v342_v8 = vld [vmem:[%s1871_s9 + $0x58] sm:$0xff] }
 0x130   : > { %v2928_v49 = vpop.eup %1679  ;;  %v966_v5 = vmul.f32 %v1687_v4, %v846_v26  ;;  %v1118_v37 = vsel %vm1115_vm14, %v1117_v11, %v1113_v40  ;;  %v1286_v24 = vmax.f32 %v1270_v38, 0.0  ;;  %vm895_vm15 = vweird.f32 %v2876_v63  ;;  %v1688_v11 = vld [vmem:[%s3023_s1 + $0x58] sm:$0xff] }
 0x131   : > { %v1314_v50 = vadd.f32 %v1313_v34, %v2237_v32  ;;  %v1238_v3 = vmul.f32 %v3150_v43, %v1118_v37  ;;  %v893_v13 = vadd.f32 %v2876_v63, %v892_v18  ;;  %v946_v35 = vmul.f32 %v2928_v49, %v2851_v53 }
 0x132   : > { %v1682_v30 = vpop.eup %1681  ;;  %v1305_v54 = vmul.f32 %v2765_v33, %v1257_v47  ;;  %v898_v29 = vand.u32 2147483647, %v2812_v21  ;;  %v900_v44 = vand.u32 2147483648, %v2812_v21  ;;  %1683 = vrcp.f32 %v2926_v48 }
 0x133   : > { %v1254_v32 = vsub.f32 %v966_v5, %v1238_v3  ;;  %v1315_v1 = vadd.f32 %v1314_v50, %v2496_v56  ;;  %vm894_vm1 = vweird.f32 %v2812_v21  ;;  %v1162_v62 = vmul.f32 %v1682_v30, %v2874_v45  ;;  %v3155_v5 = vld [vmem:[#allocation12_spill] sm:$0xff]  ;;  %v346_v3 = vld [vmem:[%s1871_s9 + $0x78] sm:$0xff] }
 0x134   : > { %v944_v59 = vsel %vm2884_vm8, %v2779_v17, %v939_v19  ;;  %v1216_v33 = vsel %vm2890_vm9, %v2786_v15, %v1211_v51  ;;  %vm2958_vm2 = vmor %vm894_vm1, %vm895_vm15  ;;  %v1274_v12 = vsub.f32 0.0, %v342_v8  ;;  %v947_v56 = vsub.f32 1.0, %v946_v35  ;;  %v345_v19 = vld [vmem:[%s1871_s9 + $0x70] sm:$0xff] }
 0x135   : > { %v1302_v47 = vmul.f32 %v1286_v24, %v1254_v32  ;;  %v1316_v21 = vadd.f32 %v1315_v1, %v2783_v41  ;;  %v897_v20 = vsel %vm2958_vm2, %v2876_v63, %v893_v13  ;;  %v1163_v17 = vsub.f32 1.0, %v1162_v62 }
 0x136   : > { %vm899_vm3 = vcmp.eq.f32.partialorder %v898_v29, 8.507059e+37  ;;  %v901_v6 = vor.u32 1.1754944e-38, %v900_v44  ;;  %v1172_v15 = vand.u32 2147483648, %v2874_v45  ;;  %v948_v22 = vmul.f32 %v2928_v49, %v947_v56 }
 0x137   : > { %v1317_v27 = vadd.f32 %v1316_v21, %v1302_v47  ;;  %v1164_v52 = vmul.f32 %v1682_v30, %v1163_v17  ;;  %vm1167_vm4 = vweird.f32 %v1682_v30  ;;  %v1170_v10 = vand.u32 2147483647, %v2874_v45 }
 0x138   : > { %v1684_v58 = vpop.eup %1683  ;;  %v902_v26 = vsel %vm899_vm3, %v901_v6, %v897_v20  ;;  %vm1166_vm5 = vweird.f32 %v2874_v45  ;;  %v1290_v41 = vmax.f32 %v1274_v12, 0.0  ;;  %vm951_vm6 = vweird.f32 %v2928_v49 }
 0x139   : > { %v1318_v63 = vadd.f32 %v1317_v27, %v2276_v2  ;;  %v1165_v38 = vadd.f32 %v1682_v30, %v1164_v52  ;;  %v949_v23 = vadd.f32 %v2928_v49, %v948_v22  ;;  %v1218_v16 = vmul.f32 %v1684_v58, %v2926_v48  ;;  %vm1168_vm7 = vmor %vm1166_vm5, %vm1167_vm4 }
 0x13a   : > { %v1173_v7 = vor.u32 1.1754944e-38, %v1172_v15  ;;  %vm950_vm8 = vweird.f32 %v2851_v53  ;;  %v954_v14 = vand.u32 2147483647, %v2851_v53  ;;  %v956_v42 = vand.u32 2147483648, %v2851_v53 }
 0x13b   : > { %v1169_v45 = vsel %vm1168_vm7, %v1682_v30, %v1165_v38  ;;  %vm1171_vm9 = vcmp.eq.f32.partialorder %v1170_v10, 8.507059e+37  ;;  %v1319_v51 = vadd.f32 %v1318_v63, %v2643_v31  ;;  %v1219_v2 = vsub.f32 1.0, %v1218_v16  ;;  %vm2984_vm10 = vmor %vm950_vm8, %vm951_vm6 }
 0x13c   : > { %v970_v34 = vmul.f32 %v1688_v11, %v902_v26  ;;  %v1174_v40 = vsel %vm1171_vm9, %v1173_v7, %v1169_v45  ;;  %v1226_v53 = vand.u32 2147483647, %v2926_v48  ;;  %v1228_v4 = vand.u32 2147483648, %v2926_v48 }
 0x13d   : > { %v1242_v37 = vmul.f32 %v3155_v5, %v1174_v40  ;;  %v953_v31 = vsel %vm2984_vm10, %v2928_v49, %v949_v23  ;;  %v1220_v24 = vmul.f32 %v1684_v58, %v1219_v2  ;;  %vm1223_vm12 = vweird.f32 %v1684_v58 }
 0x13e   : > { %v1245_v50 = vmul.f32 %v2413_v57, %v1216_v33  ;;  %v1277_v43 = vsub.f32 0.0, %v345_v19  ;;  %vm955_vm13 = vcmp.eq.f32.partialorder %v954_v14, 8.507059e+37  ;;  %v957_v8 = vor.u32 1.1754944e-38, %v956_v42 }
 0x13f   : > { %v1258_v13 = vsub.f32 %v970_v34, %v1242_v37  ;;  %v1320_v35 = vadd.f32 %v1319_v51, %v1305_v54  ;;  %v1221_v30 = vadd.f32 %v1684_v58, %v1220_v24  ;;  %vm1222_vm0 = vweird.f32 %v2926_v48 }
 0x140   : > { %v1260_v29 = vsub.f32 %v2588_v28, %v2646_v61  ;;  %v973_v44 = vmul.f32 %v944_v59, %v2403_v55  ;;  %v958_v32 = vsel %vm955_vm13, %v957_v8, %v953_v31  ;;  %vm1224_vm11 = vmor %vm1222_vm0, %vm1223_vm12  ;;  %v1229_v49 = vor.u32 1.1754944e-38, %v1228_v4  ;;  %v1689_v55 = vld [vmem:[%s3023_s1 + $0x78] sm:$0xff] }
 0x141   : > { %v1306_v1 = vmul.f32 %v1290_v41, %v1258_v13  ;;  %v1225_v62 = vsel %vm1224_vm11, %v1684_v58, %v1221_v30  ;;  %vm1227_vm14 = vcmp.eq.f32.partialorder %v1226_v53, 8.507059e+37  ;;  %v1278_v57 = vsub.f32 0.0, %v346_v3 }
 0x142   : > { %v1307_v54 = vmul.f32 %v2245_v39, %v1259_v46  ;;  %v1293_v33 = vmax.f32 %v1277_v43, 0.0  ;;  %v1230_v48 = vsel %vm1227_vm14, %v1229_v49, %v1225_v62  ;;  %v1261_v60 = vsub.f32 %v973_v44, %v1245_v50 }
 0x143   : > { %v1321_v12 = vadd.f32 %v1320_v35, %v1306_v1  ;;  %v974_v28 = vmul.f32 %v1689_v55, %v958_v32  ;;  %v1246_v61 = vmul.f32 %v2240_v9, %v1230_v48  ;;  %v1308_v59 = vmul.f32 %v2553_v25, %v1260_v29 }
 0x144   : > { %v1294_v21 = vmax.f32 %v1278_v57, 0.0  ;;  %v1309_v20 = vmul.f32 %v1293_v33, %v1261_v60 }
 0x145   : > { %v1322_v56 = vadd.f32 %v1321_v12, %v1307_v54  ;;  %v1262_v47 = vsub.f32 %v974_v28, %v1246_v61 }
 0x147   : > { %v1323_v36 = vadd.f32 %v1322_v56, %v1308_v59  ;;  %v1310_v39 = vmul.f32 %v1294_v21, %v1262_v47 }
 0x149   : > { %v1324_v0 = vadd.f32 %v1323_v36, %v1309_v20 }
 0x14b   : > { %v1325_v46 = vadd.f32 %v1324_v0, %v1310_v39 }
 0x14d   : > { %1326 = vst [vmem:[%s330_s8] sm:$0xff] %v1325_v46 }
 0x14e PF: > { %s15_s20 = sadd.s32 1, %s1712_s20   ;;  %s3156_s18 = smov %s1708_s19 }
 0x14f   : > { %p12_p5 = scmp.ge.s32.totalorder %s15_s20, 4   ;;  %s3157_s19 = smov %s3159_s21 }
 0x151   :  { %14 = sbr.rel (!%p12_p5) target bundleno = 2 (0x2), region = 76 }

</bundles_post_ra>
